<compile_context>
chip_gen: v7x
topology: tpu7x:2x2x1
jax: 0.10.0
libtpu: 0.0.40
codegen_flags: <defaults>
</compile_context>

<pallas_src>
import functools

import jax
import jax.numpy as jnp
from jax import lax
from jax.experimental import pallas as pl
from jax.experimental.pallas import tpu as pltpu

EOS_ID = 0          # index of the null / EOS character in the charset
SCORER = "mean"     # config.scorer: "mean" or "cumprod"


def _str_score_kernel(logits_ref, out_ref, *, eos_id, scorer):
    logits = logits_ref[...].astype(jnp.float32)              # (TB, T, C)
    TB, T, C = logits.shape

    # Softmax over the class axis; the max softmax prob per position equals
    # exp(max - max) / sum(exp(x - max)) = 1 / denom.
    row_max = jnp.max(logits, axis=2, keepdims=True)          # (TB, T, 1)
    denom = jnp.sum(jnp.exp(logits - row_max), axis=2)        # (TB, T)
    rm = row_max[:, :, 0]                                     # (TB, T)

    # argmax class == eos_id (first-occurrence tie-break, matching torch
    # argmax) without the full iota/select/min path:
    #   class eos_id attains the row max AND no class < eos_id attains it.
    is_eos = logits[:, :, eos_id] == rm                       # (TB, T)
    if eos_id > 0:
        prefix_max = jnp.max(logits[:, :, :eos_id], axis=2)   # (TB, T)
        is_eos = is_eos & (prefix_max < rm)

    # pred_EOS = first EOS position (T if none) -> decoded text length.
    pos = lax.broadcasted_iota(jnp.int32, (TB, T), 1)         # (TB, T)
    eos_pos = jnp.min(jnp.where(is_eos, pos, T), axis=1, keepdims=True)  # (TB,1)
    valid = pos < eos_pos                                     # (TB, T)
    count = eos_pos[:, 0].astype(jnp.float32)                 # (TB,)

    if scorer == "mean":
        # denom >= 1 (softmax denominator), so the EUP approx reciprocal
        # keeps relative error ~2^-12.
        max_prob = pl.reciprocal(denom, approx=True)          # (TB, T)
        s = jnp.sum(jnp.where(valid, max_prob, 0.0), axis=1)  # (TB,)
        conf = jnp.where(count > 0.0, s / jnp.maximum(count, 1.0), 0.0)
    else:  # "cumprod": last element of cumprod == product over valid prefix.
        # log(1/denom) = -log(denom); no reciprocal needed on this path.
        logp = jnp.where(valid, -jnp.log(denom), 0.0)         # (TB, T)
        conf = jnp.where(count > 0.0, jnp.exp(jnp.sum(logp, axis=1)), 0.0)

    # Empty-prediction rows (count == 0) stay 0, matching the PyTorch
    # `continue` (the corresponding `sum` entry is never written).
    out_ref[...] = conf[None, None, :].astype(out_ref.dtype)  # (1, 1, TB)


def _padded_rows(T, C, dtype):
    """(input_row_bytes, f32_row_bytes) per batch element after (sub,128) pad."""
    lane_c = -(-C // 128) * 128
    itemsize = jnp.dtype(dtype).itemsize
    sub_in = max(8, 32 // max(1, itemsize))        # 8 for f32, 16 for bf16
    t_in = -(-T // sub_in) * sub_in
    t_f32 = -(-T // 8) * 8
    return t_in * lane_c * itemsize, t_f32 * lane_c * 4


def _pick_block_b(B, T, C, in_dtype):
    """Batch tile sized against a ~14 MiB per-step VMEM footprint.

    Footprint model: 2x double-buffered input block (at its real dtype and
    sublane packing) + ~5 block-sized f32 temporaries. ~14 MiB keeps us under
    v5e's 16 MiB scoped-VMEM default (and well under v6e/v7x's 32 MiB) while
    making the f32 working block 2-4 MiB, which amortizes the ~0.35 us
    per-grid-step overhead (>=85% of measured HBM roofline vs ~63% at 1 MiB).
    """
    in_row, f32_row = _padded_rows(T, C, in_dtype)
    row_bytes = 2 * in_row + 5 * f32_row
    tb = max(1, min(B, min(1024, (14 << 20) // row_bytes)))
    # Prefer >= 2 grid steps when B allows it: shards the "parallel" batch
    # axis across v7x's 2 TensorCores and keeps the DMA pipeline busy.
    if tb >= B and B >= 16:
        tb = -(-B // 2)
    # TB is the sublane dim of all (TB, T) temporaries and the lane dim of
    # the (1, 1, TB) output block: multiples of 128 (or at least 8) give
    # unmasked sublane ops / unmasked vst on the output store.
    if tb >= 128:
        tb = (tb // 128) * 128
    elif tb >= 8:
        tb = (tb // 8) * 8
    return max(1, min(tb, B))


def str_score(logits, *, eos_id=EOS_ID, scorer=SCORER, block_b=None):
    """Pallas TPU implementation of STRScore.forward (default scoring path).

    logits: (B, T, C) float32 or bfloat16 -> (B, 1) float32 confidence scores.
    """
    B, T, C = logits.shape
    tb = (_pick_block_b(B, T, C, logits.dtype) if block_b is None
          else max(1, min(block_b, B)))
    g = pl.cdiv(B, tb)

    # Explicit VMEM budget matching the footprint model above (+2 MiB slack),
    # clamped to stay inside v7x's 64 MiB physical VMEM with headroom.
    in_row, f32_row = _padded_rows(T, C, logits.dtype)
    vmem_bytes = tb * (2 * in_row + 5 * f32_row) + (2 << 20)
    vmem_bytes = int(min(max(vmem_bytes, 8 << 20), 48 << 20))

    kernel = functools.partial(_str_score_kernel, eos_id=eos_id, scorer=scorer)
    out = pl.pallas_call(
        kernel,
        out_shape=jax.ShapeDtypeStruct((g, 1, tb), jnp.float32),
        grid=(g,),
        in_specs=[pl.BlockSpec((tb, T, C), lambda i: (i, 0, 0))],
        out_specs=pl.BlockSpec((1, 1, tb), lambda i: (i, 0, 0)),
        compiler_params=pltpu.CompilerParams(
            dimension_semantics=("parallel",),
            vmem_limit_bytes=vmem_bytes),
    )(logits)
    # Lane-dense (g, 1, tb) -> (B, 1), dropping any partial-tile tail rows
    # (those rows may contain garbage from the padded final block).
    return out.reshape(g * tb)[:B].reshape(B, 1)


def _reference(logits, eos_id, scorer):
    """Pure JAX re-implementation of the PyTorch forward (per-sample loop)."""
    probs = jax.nn.softmax(logits.astype(jnp.float32), axis=2)
    max_prob = jnp.max(probs, axis=2)
    max_idx = jnp.argmax(probs, axis=2)
    B, T = max_prob.shape
    out = []
    for b in range(B):
        idx = max_idx[b]
        eos_positions = jnp.where(idx == eos_id, jnp.arange(T), T)
        eos = int(jnp.min(eos_positions))
        pm = max_prob[b, :eos]
        if pm.shape[0] == 0:
            out.append(0.0)
        elif scorer == "mean":
            out.append(float(jnp.mean(pm)))
        else:
            out.append(float(jnp.cumprod(pm)[-1]))
    return jnp.asarray(out, jnp.float32).reshape(B, 1)


if __name__ == "__main__":
    key = jax.random.PRNGKey(0)
    ok = True

    # (batch, max decode length, charset size incl. null), dtype, tile, eos_id
    cases = [
        (2, 8, 37, jnp.float32, None, 0),   # toy shape, single tile
        (9, 8, 37, jnp.bfloat16, 4, 0),     # bf16 input, 3 tiles incl. partial
        (8, 12, 37, jnp.float32, None, 5),  # non-zero eos_id (prefix-max path)
    ]
    for (B, T, C, dtype, block_b, eos_id) in cases:
        key, sub = jax.random.split(key)
        logits = jax.random.normal(sub, (B, T, C), dtype=jnp.float32)
        logits = logits.astype(dtype)
        for scorer in ("mean", "cumprod"):
            out = jax.block_until_ready(
                str_score(logits, eos_id=eos_id, scorer=scorer,
                          block_b=block_b))
            ref = _reference(logits, eos_id, scorer)
            # Tolerance relaxed slightly for the approx (EUP) reciprocal.
            if out.shape != (B, 1) or not bool(
                jnp.allclose(out, ref, atol=2e-3, rtol=2e-3)
            ):
                ok = False
                print(
                    f"MISMATCH B={B} dtype={jnp.dtype(dtype).name} "
                    f"eos_id={eos_id} scorer={scorer}: "
                    f"kernel={out.ravel()} ref={ref.ravel()}"
                )

    if ok:
        print("KERNEL_OK")
</pallas_src>

<mosaic_0001>
module attributes {stable_mosaic.version = 11 : i64} {
  func.func @_str_score_kernel(%arg0: i32, %arg1: memref<2x8x37xf32, #tpu.memory_space<vmem>>, %arg2: memref<1x1x2xf32, #tpu.memory_space<vmem>>) attributes {dimension_semantics = [#tpu.dimension_semantics<parallel>], iteration_bounds = array<i64: 1>, scalar_prefetch = 0 : i64, scratch_operands = 0 : i64, tpu.core_type = #tpu.core_type<tc>, window_params = [{transform_indices = @transform_0, window_bounds = array<i64: 2, 8, 37>}, {transform_indices = @transform_1, window_bounds = array<i64: 1, 1, 2>}]} {
    %c0 = arith.constant 0 : index
    %c0_0 = arith.constant 0 : index
    %c0_1 = arith.constant 0 : index
    %0 = vector.load %arg1[%c0, %c0_0, %c0_1] : memref<2x8x37xf32, #tpu.memory_space<vmem>>, vector<2x8x37xf32>
    %cst = arith.constant dense<0xFF800000> : vector<2x8xf32>
    %1 = vector.multi_reduction <maximumf>, %0, %cst [2] : vector<2x8x37xf32> to vector<2x8xf32>
    %2 = vector.shape_cast %1 : vector<2x8xf32> to vector<2x8x1xf32>
    %3 = vector.broadcast %2 : vector<2x8x1xf32> to vector<2x8x37xf32>
    %4 = arith.subf %0, %3 : vector<2x8x37xf32>
    %5 = math.exp %4 : vector<2x8x37xf32>
    %cst_2 = arith.constant dense<0.000000e+00> : vector<2x8xf32>
    %6 = vector.multi_reduction <add>, %5, %cst_2 [2] : vector<2x8x37xf32> to vector<2x8xf32>
    %7 = vector.shape_cast %2 : vector<2x8x1xf32> to vector<2x8xf32>
    %8 = vector.extract_strided_slice %0 {offsets = [0, 0, 0], sizes = [2, 8, 1], strides = [1, 1, 1]} : vector<2x8x37xf32> to vector<2x8x1xf32>
    %9 = vector.shape_cast %8 : vector<2x8x1xf32> to vector<2x8xf32>
    %10 = arith.cmpf oeq, %9, %7 : vector<2x8xf32>
    %11 = tpu.iota {dimensions = array<i32: 1>} : vector<2x8xi32>
    %c8_i32 = arith.constant 8 : i32
    %12 = vector.broadcast %c8_i32 : i32 to vector<2x8xi32>
    %13 = arith.select %10, %11, %12 : vector<2x8xi1>, vector<2x8xi32>
    %cst_3 = arith.constant dense<2147483647> : vector<2xi32>
    %14 = vector.multi_reduction <minsi>, %13, %cst_3 [1] : vector<2x8xi32> to vector<2xi32>
    %15 = vector.shape_cast %14 : vector<2xi32> to vector<2x1xi32>
    %16 = vector.broadcast %15 : vector<2x1xi32> to vector<2x8xi32>
    %17 = arith.cmpi slt, %11, %16 : vector<2x8xi32>
    %18 = vector.shape_cast %15 : vector<2x1xi32> to vector<2xi32>
    %19 = arith.sitofp %18 : vector<2xi32> to vector<2xf32>
    %20 = tpu.reciprocal %6 {approx = true} : vector<2x8xf32> -> vector<2x8xf32>
    %cst_4 = arith.constant 0.000000e+00 : f32
    %21 = vector.broadcast %cst_4 : f32 to vector<2x8xf32>
    %22 = arith.select %17, %20, %21 : vector<2x8xi1>, vector<2x8xf32>
    %cst_5 = arith.constant dense<0.000000e+00> : vector<2xf32>
    %23 = vector.multi_reduction <add>, %22, %cst_5 [1] : vector<2x8xf32> to vector<2xf32>
    %cst_6 = arith.constant 0.000000e+00 : f32
    %24 = vector.broadcast %cst_6 : f32 to vector<2xf32>
    %25 = arith.cmpf ogt, %19, %24 : vector<2xf32>
    %cst_7 = arith.constant 1.000000e+00 : f32
    %26 = vector.broadcast %cst_7 : f32 to vector<2xf32>
    %27 = arith.maximumf %19, %26 : vector<2xf32>
    %28 = arith.divf %23, %27 : vector<2xf32>
    %cst_8 = arith.constant 0.000000e+00 : f32
    %29 = vector.broadcast %cst_8 : f32 to vector<2xf32>
    %30 = arith.select %25, %28, %29 : vector<2xi1>, vector<2xf32>
    %31 = vector.shape_cast %30 : vector<2xf32> to vector<1x1x2xf32>
    %c0_9 = arith.constant 0 : index
    %c0_10 = arith.constant 0 : index
    %c0_11 = arith.constant 0 : index
    %32 = vector.load %arg2[%c0_9, %c0_10, %c0_11] : memref<1x1x2xf32, #tpu.memory_space<vmem>>, vector<1x1x2xf32>
    tpu.vector_store %arg2[%c0_9, %c0_10, %c0_11], %31 {strides = array<i32>} : memref<1x1x2xf32, #tpu.memory_space<vmem>>, vector<1x1x2xf32>,
    return
  }
  func.func @transform_0(%arg0: i32) -> (i32, i32, i32) {
    %c0_i32 = arith.constant 0 : i32
    %c0_i32_0 = arith.constant 0 : i32
    %c0_i32_1 = arith.constant 0 : i32
    return %arg0, %c0_i32, %c0_i32_0 : i32, i32, i32
  }
  func.func @transform_1(%arg0: i32) -> (i32, i32, i32) {
    %c0_i32 = arith.constant 0 : i32
    %c0_i32_0 = arith.constant 0 : i32
    %c0_i32_1 = arith.constant 0 : i32
    return %arg0, %c0_i32, %c0_i32_0 : i32, i32, i32
  }
}

</mosaic_0001>

<bundles_post_ra>
// kernel: tpu_custom_call.1
= control target key start
LH: loop header
LB: loop body
LE: loop exit
PB: predicated region body
PF: predicated region fallthrough
CT: control target
= control target key end

     0   :  { %6 = vsyncpa [#allocation3], 0  ;;  %s250_s0 = inlined_call_operand.hbm [shape: f32[2,8,37], index: 0, kind: input, shape index: {}]   ;;  %s251_s1 = inlined_call_operand.hbm [shape: f32[1,1,2], index: 1, kind: output, shape index: {}]  }
   0x1   :  { %7 = vsyncpa [#allocation4], 0  ;;  %s198_s6 = smov [#allocation2]   ;;  %s150_s10 = scalar_lea.hbm %s250_s0, 256 }
   0x2   :  { %s13_s7 = sshll.u32 %s198_s6, 4  ;;  %p151_p0 = scmp.ne.s32.totalorder %s250_s0, %s150_s10  ;;  %s14_s7 = int_to_ptr.vmem [resolvable:$true] %s13_s7 }
   0x3   :  { %p154_p1 = scmp.lt.u32.totalorder %s150_s10, %s250_s0 }
   0x5   :  { %p156_p2 = pnand %p154_p1, %p151_p0 }
   0x7   :  { %159 = shalt.err (!%p156_p2)
}
   0x8   :  { %s160_s15 = scalar_lea.vmem %s14_s7, 256  ;;  %p165_p4 = scmp.lt.s32.totalorder %s14_s7, %s14_s7 }
   0x9   :  { %p161_p3 = scmp.ne.s32.totalorder %s14_s7, %s160_s15  ;;  %p166_p5 = scmp.lt.s32.totalorder %s160_s15, %s160_s15 }
   0xb   :  { %p167_p6 = por %p166_p5, %p165_p4 }
   0xd   :  { %p168_p7 = pnand %p167_p6, %p161_p3 }
   0xf   :  { %171 = shalt.err (!%p168_p7)
}
  0x10   :  { %s199_s16 = smov 128   ;;  %s200_s17 = smov 8  }
  0x11   :  { %19 = dma.hbm_to_vmem [thread:$0]  %s250_s0, 256, %s14_s7, [#allocation3], %s199_s16, %s199_s16, %s200_s17  }
  0x12   :  { %194 = dma.done.wait [#allocation3], 256  }
  0x13   :  { %195 = vsyncadd [#allocation3], 4294967040  ;;  %v46_v0 = vlaneseq  ;;  %vm25_vm0 = vcmask 302080   ;;  %v23_v2 = vld [vmem:[#allocation2] sm:$0xff]  ;;  %v24_v3 = vld [vmem:[#allocation2 + $0x8] sm:$0xff]  ;;  %v201_v6 = vmov 0  }
  0x14   :  { %v26_v4 = vsel %vm25_vm0, %v23_v2, -inf  ;;  %v29_v5 = vsel %vm25_vm0, %v24_v3, -inf  ;;  %138 = vset.pattern.permute.xlu1 %v201_v6  ;;  %139 = vset.pattern.permute.xlu0 %v201_v6  ;;  %vm67_vm3 = vcmask 1041409   ;;  %vm69_vm4 = vcmask 58368   ;;  %s202_s0 = smov [#allocation5]  }
  0x15   :  { %v225_v1 = vand.u32 127, %v46_v0  ;;  %27 = vmax.xlane.f32.xlu0 %v26_v4  ;;  %v60_v13 = vshrl.u32 %v46_v0, 7  ;;  %s124_s20 = sshll.u32 %s202_s0, 4  ;;  %vm116_vm8 = vcmask 8192   ;;  %s125_s20 = int_to_ptr.vmem [resolvable:$true] %s124_s20 }
  0x16   :  { %s172_s21 = scalar_lea.vmem %s125_s20, 16  ;;  %s176_s22 = scalar_lea.vmem %s125_s20, 32 }
  0x17   :  { %49 = vbcast.lane.b32.xlu1 %v225_v1, 256  ;;  %v61_v16 = vsub.s32 %v225_v1, %v60_v13  ;;  %p173_p8 = scmp.ne.s32.totalorder %s125_s20, %s172_s21  ;;  %p177_p9 = scmp.lt.s32.totalorder %s125_s20, %s125_s20 }
  0x18   :  { %p178_p10 = scmp.lt.s32.totalorder %s176_s22, %s172_s21 }
  0x19   :  { %30 = vmax.xlane.f32.xlu0 %v29_v5 }
  0x1a   :  { %p179_p11 = por %p178_p10, %p177_p9 }
  0x1c   :  { %p180_p12 = pnand %p179_p11, %p173_p8 }
  0x89   :  { %v50_v7 = vpop.permute.xlu1 %49 }
  0xa2   :  { %v28_v8 = vpop.xlane.xlu0 %27 }
  0xa3   :  { %vm44_vm1 = vcmp.eq.f32.partialorder %v23_v2, %v28_v8  ;;  %v32_v12 = vsub.f32 %v23_v2, %v28_v8 }
  0xa4   :  { %v51_v9 = vsel %vm44_vm1, %v50_v7, 8 }
  0xa5   :  { %54 = vperm.xlu1 %138, %v51_v9   ;;  %v34_v14 = vmul.f32 1.442695, %v32_v12 }
  0xa6   :  { %v31_v10 = vpop.xlane.xlu0 %30 }
  0xa7   :  { %vm45_vm2 = vcmp.eq.f32.partialorder %v24_v3, %v31_v10  ;;  %v33_v15 = vsub.f32 %v24_v3, %v31_v10  ;;  %140 = vpow2.f32 %v34_v14 }
  0xa8   :  { %v52_v11 = vsel %vm45_vm2, %v50_v7, 8 }
  0xa9   :  { %57 = vperm.xlu0 %139, %v52_v11   ;;  %v36_v18 = vmul.f32 1.442695, %v33_v15 }
  0xab   :  { %142 = vpow2.f32 %v36_v18 }
  0xb1   :  { %v141_v26 = vpop.eup %140 }
  0xb2   :  { %v38_v27 = vsel %vm25_vm0, %v141_v26, 0.0 }
  0xb5   :  { %v143_v28 = vpop.eup %142 }
  0xb6   :  { %v41_v29 = vsel %vm25_vm0, %v143_v28, 0.0 }
 0x124   :  { %v55_v17 = vpop.permute.xlu1 %54 }
 0x125   :  { %v62_v20 = vrot.slane %v55_v17, %v61_v16 }
 0x128   :  { %v58_v19 = vpop.permute.xlu0 %57 }
 0x129   :  { %v66_v21 = vrot.slane %v58_v19, %v61_v16 }
 0x12b   :  { %v68_v22 = vsel %vm67_vm3, %v66_v21, %v62_v20 }
 0x12c   :  { %v70_v23 = vsel %vm69_vm4, %v68_v22, 2147483647 }
 0x12d   :  { %v72_v24 = vshra.s32 %v70_v23, 16  ;;  %v71_v30 = vand.u32 65535, %v70_v23 }
 0x12f   :  { %v74_v25 = vcvt.s32.f32 %v72_v24  ;;  %v73_v32 = vcvt.s32.f32 %v71_v30 }
 0x131   :  { %75 = vmin.xlane.f32.xlu1 %v74_v25 }
 0x135   :  { %39 = vadd.xlane.f32.xlu1 %v38_v27 }
 0x139   :  { %42 = vadd.xlane.f32.xlu1 %v41_v29 }
 0x1be   :  { %v76_v31 = vpop.xlane.xlu1 %75 }
 0x1bf   :  { %vm77_vm5 = vcmp.eq.f32.partialorder %v74_v25, %v76_v31  ;;  %v82_v36 = vcvt.f32.s32 %v76_v31 }
 0x1c0   :  { %v78_v33 = vsel %vm77_vm5, %v73_v32, inf }
 0x1c1   :  { %79 = vmin.xlane.f32.xlu0 %v78_v33  ;;  %v83_v40 = vshll.u32 %v82_v36, 16 }
 0x1c2   :  { %v40_v34 = vpop.xlane.xlu1 %39 }
 0x1c6   :  { %v43_v35 = vpop.xlane.xlu1 %42 }
 0x1c7   :  { %144 = vrcp.f32 %v43_v35 }
 0x1c8   :  { %146 = vrcp.f32 %v40_v34 }
 0x1d1   :  { %v145_v37 = vpop.eup %144 }
 0x1d2   :  { %v147_v38 = vpop.eup %146  ;;  %v98_v42 = vrot.slane %v145_v37, %v61_v16 }
 0x1d3   :  { %v94_v44 = vrot.slane %v147_v38, %v61_v16 }
 0x1d5   :  { %v99_v45 = vsel %vm67_vm3, %v98_v42, %v94_v44 }
 0x24e   :  { %v80_v39 = vpop.xlane.xlu0 %79 }
 0x24f   :  { %v81_v41 = vcvt.f32.s32 %v80_v39 }
 0x251   :  { %v84_v43 = vadd.s32 %v83_v40, %v81_v41 }
 0x253   :  { %vm85_vm6 = vcmp.lt.s32.totalorder %v225_v1, %v84_v43  ;;  %v86_v48 = vcvt.s32.f32 %v84_v43 }
 0x254   :  { %v101_v46 = vsel %vm85_vm6, %v99_v45, 0.0 }
 0x255   :  { %v102_v47 = vsel %vm69_vm4, %v101_v46, 0.0  ;;  %v106_v49 = vmax.f32 %v86_v48, 1.0  ;;  %vm105_vm7 = vcmp.gt.f32.partialorder %v86_v48, 0.0 }
 0x256   :  { %103 = vadd.xlane.f32.xlu1 %v102_v47 }
 0x257   :  { %148 = vrcp.f32 %v106_v49 }
 0x261   :  { %v149_v50 = vpop.eup %148 }
 0x2e3   :  { %v104_v51 = vpop.xlane.xlu1 %103 }
 0x2e4   :  { %v108_v52 = vmul.f32 %v149_v50, %v104_v51 }
 0x2e6   :  { %v109_v53 = vsel %vm105_vm7, %v108_v52, 0.0 }
 0x2e7   :  { %v114_v54 = vrot.slane %v109_v53, %v61_v16 }
 0x2e9   :  { %117 = vst.msk [vmem:[#allocation5] sm:$0x1] %vm116_vm8, %v114_v54 }
 0x2ea   :  { %183 = shalt.err (!%p180_p12)
}
 0x2eb   :  { %s184_s25 = scalar_lea.hbm %s251_s1, 16 }
 0x2ec   :  { %p185_p13 = scmp.ne.s32.totalorder %s251_s1, %s184_s25  ;;  %p188_p0 = scmp.lt.u32.totalorder %s184_s25, %s251_s1 }
 0x2ee   :  { %p190_p1 = pnand %p188_p0, %p185_p13 }
 0x2f0   :  { %193 = shalt.err (!%p190_p1)
}
 0x2f1   :  { %127 = dma.vmem_to_hbm [thread:$0]  %s125_s20, 16, %s251_s1, [#allocation4]  }
 0x2f2   :  { %196 = dma.done.wait [#allocation4], 16  }
 0x2f3   :  { %197 = vsyncadd [#allocation4], 4294967280 }
 0x2f4   :  { %131 = vsyncpa [#allocation3], 1 }
 0x2f5   :  { %132 = vsyncpa [#allocation4], 1 }

</bundles_post_ra>
